<compile_context>
chip_gen: v7x
topology: tpu7x:2x2x1
jax: 0.10.0
libtpu: 0.0.40
codegen_flags: <defaults>
</compile_context>

<pallas_src>
import functools

import jax
import jax.numpy as jnp
from jax.experimental import pallas as pl
from jax.experimental.pallas import tpu as pltpu

_LANE = 128


def _soft_dice_kernel(m1_ref, m2_ref, inter_ref, denom_ref, *,
                      f_valid, block_lanes, chunk_lanes, k_per_split,
                      needs_mask, unroll):
    """Accumulate per-sample lane-parallel sums of m1*m2 and m1+m2."""
    s = pl.program_id(0)
    k = pl.program_id(1)

    @pl.when(k == 0)
    def _init():
        inter_ref[...] = jnp.zeros_like(inter_ref)
        denom_ref[...] = jnp.zeros_like(denom_ref)

    n = m1_ref.shape[0]
    n_chunks = block_lanes // chunk_lanes
    zeros = jnp.zeros((n, chunk_lanes), jnp.float32)

    def accumulate(body):
        acc_i, acc_d = jax.lax.fori_loop(0, n_chunks, body, (zeros, zeros),
                                         unroll=unroll)
        inter_ref[...] += acc_i
        denom_ref[...] += acc_d

    def plain_body(j, carry):
        acc_i, acc_d = carry
        off = pl.multiple_of(j * chunk_lanes, chunk_lanes)
        a = m1_ref[:, pl.ds(off, chunk_lanes)].astype(jnp.float32)
        b = m2_ref[:, pl.ds(off, chunk_lanes)].astype(jnp.float32)
        return acc_i + a * b, acc_d + (a + b)

    if needs_mask:
        # Unclamped start lane of this grid step.  The index_map clamps the
        # DMA to the last real block; the mask below zeroes lanes >= f_valid
        # (ragged tail and phantom steps), so NaN/garbage cannot escape.
        vstart = (s * k_per_split + k) * block_lanes

        def masked_body(j, carry):
            acc_i, acc_d = carry
            off = pl.multiple_of(j * chunk_lanes, chunk_lanes)
            a = m1_ref[:, pl.ds(off, chunk_lanes)].astype(jnp.float32)
            b = m2_ref[:, pl.ds(off, chunk_lanes)].astype(jnp.float32)
            lane = jax.lax.broadcasted_iota(jnp.int32, (n, chunk_lanes), 1)
            valid = (vstart + off + lane) < f_valid
            return (acc_i + jnp.where(valid, a * b, 0.0),
                    acc_d + jnp.where(valid, a + b, 0.0))

        @pl.when(vstart + block_lanes <= f_valid)
        def _full():
            accumulate(plain_body)

        @pl.when(vstart + block_lanes > f_valid)
        def _ragged():
            accumulate(masked_body)
    else:
        accumulate(plain_body)


def _round_up(x, m):
    return ((x + m - 1) // m) * m


def _streamable(x):
    """Keep the operand in a dtype the kernel can stream natively."""
    if jnp.issubdtype(x.dtype, jnp.floating):
        return x
    if x.dtype == jnp.bool_:
        return x.astype(jnp.int8)          # 1 B/elem mask; kernel casts to f32
    if x.dtype.itemsize in (1, 4):
        return x                            # int8 / uint8 / int32 / uint32
    return x.astype(jnp.int32)              # int16 / int64 / ...


def _tpu_defaults():
    kind = ""
    try:
        kind = jax.devices()[0].device_kind.lower()
    except Exception:  # pragma: no cover - e.g. interpret mode
        pass
    if "v7" in kind:
        # 2 TensorCores / chip but only 64 MiB VMEM per core.
        return 2, 8 * 1024 * 1024, 48 * 1024 * 1024
    if "v4" in kind or "v5p" in kind:
        # Megacore generations: 2 TCs, 128 MiB VMEM.
        return 2, 16 * 1024 * 1024, 96 * 1024 * 1024
    # v5e / v6e (single TensorCore, 128 MiB VMEM) and anything unknown.
    return 1, 16 * 1024 * 1024, 96 * 1024 * 1024


@functools.partial(
    jax.jit, static_argnames=("nsplit", "block_bytes", "vmem_limit_bytes"))
def _soft_dice_loss_impl(inputs, targets, *, nsplit, block_bytes,
                         vmem_limit_bytes):
    smooth = 1.0
    n = targets.shape[0]
    m1 = _streamable(inputs).reshape(n, -1)
    m2 = _streamable(targets).reshape(n, -1)
    f = m1.shape[1]

    if f < _LANE:
        # TODO(synk): degenerate tiny feature counts fall back to plain JAX;
        # a kernel launch would be pure overhead here.
        a = m1.astype(jnp.float32)
        b = m2.astype(jnp.float32)
        score = (2.0 * (a * b).sum(1) + smooth) / (a.sum(1) + b.sum(1) + smooth)
        return 1.0 - score.sum() / n

    # Lane-parallel chunk width: keep both f32 accumulators plus two operand
    # chunks comfortably inside the vreg file for typical batch sizes.
    sub_tiles = (n + 7) // 8
    ch = max(_LANE, (8 // min(8, sub_tiles)) * _LANE)
    ch = min(ch, max(_LANE, (f // _LANE) * _LANE))
    # TODO(synk): for very large batches (N >> 64) an extra batch-tiling grid
    # axis would keep register pressure / VMEM footprint bounded.

    # Block width in lanes: physical VMEM footprint per lane column accounts
    # for sublane padding of small batches and sub-32-bit packing.
    isz1, isz2 = m1.dtype.itemsize, m2.dtype.itemsize
    phys1 = _round_up(n, 32 // isz1) * isz1
    phys2 = _round_up(n, 32 // isz2) * isz2
    lanes_cap = (block_bytes // max(phys1, phys2)) // ch * ch
    # 2 operands x 2 pipeline buffers must fit in ~3/4 of the VMEM budget.
    lanes_vmem = ((vmem_limit_bytes * 3 // 4) // (2 * (phys1 + phys2))) // ch * ch
    tf_budget = max(ch, min(lanes_cap, lanes_vmem))

    nsplit = max(1, min(nsplit, pl.cdiv(f, ch)))
    lanes_per_split = pl.cdiv(f, nsplit)
    # tf never exceeds the feature count, so only the last block may overhang.
    tf = min(tf_budget, pl.cdiv(lanes_per_split, ch) * ch,
             max(ch, (f // ch) * ch))
    k_total = pl.cdiv(f, tf)
    nsplit = max(1, min(nsplit, k_total))
    k_per_split = pl.cdiv(k_total, nsplit)
    last_blk = k_total - 1
    needs_mask = (nsplit * k_per_split * tf) != f

    def in_map(s_idx, k_idx):
        # Phantom steps past the end re-read this split's last real block (the
        # pipeline skips a repeat DMA); the kernel masks them to exactly zero.
        return (0, jnp.minimum(s_idx * k_per_split + k_idx, last_blk))

    kernel = functools.partial(
        _soft_dice_kernel,
        f_valid=f, block_lanes=tf, chunk_lanes=ch,
        k_per_split=k_per_split, needs_mask=needs_mask,
        unroll=min(4, max(1, tf // ch)))

    cost = pl.CostEstimate(
        flops=4 * n * f,
        transcendentals=0,
        bytes_accessed=m1.size * isz1 + m2.size * isz2
        + 2 * nsplit * n * ch * 4)

    inter_p, denom_p = pl.pallas_call(
        kernel,
        out_shape=(
            jax.ShapeDtypeStruct((nsplit, n, ch), jnp.float32),
            jax.ShapeDtypeStruct((nsplit, n, ch), jnp.float32),
        ),
        grid_spec=pltpu.PrefetchScalarGridSpec(
            num_scalar_prefetch=0,
            grid=(nsplit, k_per_split),
            in_specs=[
                pl.BlockSpec((n, tf), in_map),
                pl.BlockSpec((n, tf), in_map),
            ],
            out_specs=(
                pl.BlockSpec((None, n, ch), lambda s, k: (s, 0, 0)),
                pl.BlockSpec((None, n, ch), lambda s, k: (s, 0, 0)),
            ),
        ),
        compiler_params=pltpu.CompilerParams(
            dimension_semantics=("parallel", "arbitrary"),
            vmem_limit_bytes=vmem_limit_bytes,
        ),
        cost_estimate=cost,
    )(m1, m2)

    # Tiny epilogue in plain JAX: combine per-split, per-lane partials.
    inter = inter_p.sum(axis=(0, 2))      # (N,)  sum(m1 * m2)
    denom = denom_p.sum(axis=(0, 2))      # (N,)  sum(m1) + sum(m2)
    score = (2.0 * inter + smooth) / (denom + smooth)
    return 1.0 - score.sum() / n


def soft_dice_loss(inputs, targets, *, nsplit=None, block_bytes=None,
                   vmem_limit_bytes=None):
    """Pallas implementation of SoftDiceLoss.forward(inputs, targets)."""
    d_nsplit, d_block, d_vmem = _tpu_defaults()
    return _soft_dice_loss_impl(
        inputs, targets,
        nsplit=d_nsplit if nsplit is None else nsplit,
        block_bytes=d_block if block_bytes is None else block_bytes,
        vmem_limit_bytes=d_vmem if vmem_limit_bytes is None else vmem_limit_bytes)


def _reference(inputs, targets):
    smooth = 1.0
    n = targets.shape[0]
    m1 = inputs.reshape(n, -1).astype(jnp.float32)
    m2 = targets.reshape(n, -1).astype(jnp.float32)
    inter = (m1 * m2).sum(1)
    score = (2.0 * inter + smooth) / (m1.sum(1) + m2.sum(1) + smooth)
    return 1.0 - score.sum() / n


if __name__ == "__main__":
    key = jax.random.PRNGKey(0)
    k1, k2, k3, k4, k5, k6 = jax.random.split(key, 6)

    # 1) Primary NCHW case, f32 predictions vs f32 {0,1} masks (F = 1024).
    x = jax.random.uniform(k1, (2, 4, 16, 16), dtype=jnp.float32)
    t = (jax.random.uniform(k2, (2, 4, 16, 16)) > 0.5).astype(jnp.float32)
    loss = jax.block_until_ready(soft_dice_loss(x, t))
    ref = _reference(x, t)
    assert jnp.allclose(loss, ref, rtol=1e-5, atol=1e-5), (loss, ref)

    # 2) bf16 predictions vs native bool masks with a ragged feature count
    #    (F = 1200, not a multiple of 128): exercises the lane mask and the
    #    1 B/elem target streaming without any wrapper pad or f32 copy.
    xb = jax.random.uniform(k3, (2, 3, 20, 20)).astype(jnp.bfloat16)
    tb = jax.random.uniform(k4, (2, 3, 20, 20)) > 0.5
    loss_b = jax.block_until_ready(soft_dice_loss(xb, tb))
    ref_b = _reference(xb, tb)
    assert jnp.allclose(loss_b, ref_b, rtol=1e-5, atol=1e-5), (loss_b, ref_b)

    # 3) Multi-block accumulation + explicit 2-way split (tiny block budget).
    xc = jax.random.uniform(k5, (2, 8, 32, 32), dtype=jnp.float32)
    tc = (jax.random.uniform(k6, (2, 8, 32, 32)) > 0.5).astype(jnp.float32)
    loss_c = jax.block_until_ready(
        soft_dice_loss(xc, tc, nsplit=2, block_bytes=4096))
    ref_c = _reference(xc, tc)
    assert jnp.allclose(loss_c, ref_c, rtol=1e-5, atol=1e-5), (loss_c, ref_c)

    # 4) Phantom grid steps: 3 real blocks split across 2 "cores".
    xd = jax.random.uniform(k1, (2, 3, 32, 32), dtype=jnp.float32)
    td = (jax.random.uniform(k2, (2, 3, 32, 32)) > 0.5).astype(jnp.float32)
    loss_d = jax.block_until_ready(
        soft_dice_loss(xd, td, nsplit=2, block_bytes=4096))
    ref_d = _reference(xd, td)
    assert jnp.allclose(loss_d, ref_d, rtol=1e-5, atol=1e-5), (loss_d, ref_d)

    print("KERNEL_OK")
</pallas_src>

<mosaic_0001>
module attributes {stable_mosaic.version = 11 : i64} {
  func.func @_soft_dice_kernel(%arg0: i32, %arg1: i32, %arg2: memref<2x1024xf32, #tpu.memory_space<vmem>>, %arg3: memref<2x1024xf32, #tpu.memory_space<vmem>>, %arg4: memref<1x2x1024xf32, #tpu.memory_space<vmem>>, %arg5: memref<1x2x1024xf32, #tpu.memory_space<vmem>>) attributes {dimension_semantics = [#tpu.dimension_semantics<parallel>, #tpu.dimension_semantics<arbitrary>], iteration_bounds = array<i64: 1, 1>, scalar_prefetch = 0 : i64, scratch_operands = 0 : i64, tpu.core_type = #tpu.core_type<tc>, window_params = [{transform_indices = @transform_0, window_bounds = array<i64: 2, 1024>}, {transform_indices = @transform_1, window_bounds = array<i64: 2, 1024>}, {transform_indices = @transform_2, window_bounds = array<i64: 1, 2, 1024>}, {transform_indices = @transform_3, window_bounds = array<i64: 1, 2, 1024>}]} {
    %c0_i32 = arith.constant 0 : i32
    %0 = arith.cmpi eq, %arg1, %c0_i32 : i32
    %1 = arith.extui %0 : i1 to i32
    %c0_i32_0 = arith.constant 0 : i32
    %2 = arith.cmpi ne, %1, %c0_i32_0 : i32
    scf.if %2 {
      %cst_15 = arith.constant 0.000000e+00 : f32
      %26 = vector.broadcast %cst_15 : f32 to vector<2x1024xf32>
      %c0_16 = arith.constant 0 : index
      %c0_17 = arith.constant 0 : index
      %c0_18 = arith.constant 0 : index
      %27 = vector.load %arg4[%c0_16, %c0_17, %c0_18] : memref<1x2x1024xf32, #tpu.memory_space<vmem>>, vector<1x2x1024xf32>
      %28 = vector.shape_cast %27 : vector<1x2x1024xf32> to vector<2x1024xf32>
      %29 = vector.shape_cast %26 : vector<2x1024xf32> to vector<1x2x1024xf32>
      tpu.vector_store %arg4[%c0_16, %c0_17, %c0_18], %29 {strides = array<i32>} : memref<1x2x1024xf32, #tpu.memory_space<vmem>>, vector<1x2x1024xf32>,
      %cst_19 = arith.constant 0.000000e+00 : f32
      %30 = vector.broadcast %cst_19 : f32 to vector<2x1024xf32>
      %c0_20 = arith.constant 0 : index
      %c0_21 = arith.constant 0 : index
      %c0_22 = arith.constant 0 : index
      %31 = vector.load %arg5[%c0_20, %c0_21, %c0_22] : memref<1x2x1024xf32, #tpu.memory_space<vmem>>, vector<1x2x1024xf32>
      %32 = vector.shape_cast %31 : vector<1x2x1024xf32> to vector<2x1024xf32>
      %33 = vector.shape_cast %30 : vector<2x1024xf32> to vector<1x2x1024xf32>
      tpu.vector_store %arg5[%c0_20, %c0_21, %c0_22], %33 {strides = array<i32>} : memref<1x2x1024xf32, #tpu.memory_space<vmem>>, vector<1x2x1024xf32>,
    } else {
    }
    %cst = arith.constant 0.000000e+00 : f32
    %3 = vector.broadcast %cst : f32 to vector<2x1024xf32>
    %c0_i32_1 = arith.constant 0 : i32
    %c1024_i32 = arith.constant 1024 : i32
    %4 = arith.muli %c0_i32_1, %c1024_i32 : i32
    %5 = tpu.assume_multiple %4, 1024 : i32
    %c0 = arith.constant 0 : index
    %6 = arith.index_cast %5 : i32 to index
    %7 = vector.load %arg2[%c0, %6] : memref<2x1024xf32, #tpu.memory_space<vmem>>, vector<2x1024xf32>
    %c0_2 = arith.constant 0 : index
    %8 = arith.index_cast %5 : i32 to index
    %9 = vector.load %arg3[%c0_2, %8] : memref<2x1024xf32, #tpu.memory_space<vmem>>, vector<2x1024xf32>
    %10 = arith.mulf %7, %9 : vector<2x1024xf32>
    %11 = arith.addf %3, %10 : vector<2x1024xf32>
    %12 = arith.addf %7, %9 : vector<2x1024xf32>
    %13 = arith.addf %3, %12 : vector<2x1024xf32>
    %c1_i32 = arith.constant 1 : i32
    %c0_3 = arith.constant 0 : index
    %c0_4 = arith.constant 0 : index
    %c0_5 = arith.constant 0 : index
    %14 = vector.load %arg4[%c0_3, %c0_4, %c0_5] : memref<1x2x1024xf32, #tpu.memory_space<vmem>>, vector<1x2x1024xf32>
    %15 = vector.shape_cast %14 : vector<1x2x1024xf32> to vector<2x1024xf32>
    %16 = arith.addf %15, %11 : vector<2x1024xf32>
    %c0_6 = arith.constant 0 : index
    %c0_7 = arith.constant 0 : index
    %c0_8 = arith.constant 0 : index
    %17 = vector.load %arg4[%c0_6, %c0_7, %c0_8] : memref<1x2x1024xf32, #tpu.memory_space<vmem>>, vector<1x2x1024xf32>
    %18 = vector.shape_cast %17 : vector<1x2x1024xf32> to vector<2x1024xf32>
    %19 = vector.shape_cast %16 : vector<2x1024xf32> to vector<1x2x1024xf32>
    tpu.vector_store %arg4[%c0_6, %c0_7, %c0_8], %19 {strides = array<i32>} : memref<1x2x1024xf32, #tpu.memory_space<vmem>>, vector<1x2x1024xf32>,
    %c0_9 = arith.constant 0 : index
    %c0_10 = arith.constant 0 : index
    %c0_11 = arith.constant 0 : index
    %20 = vector.load %arg5[%c0_9, %c0_10, %c0_11] : memref<1x2x1024xf32, #tpu.memory_space<vmem>>, vector<1x2x1024xf32>
    %21 = vector.shape_cast %20 : vector<1x2x1024xf32> to vector<2x1024xf32>
    %22 = arith.addf %21, %13 : vector<2x1024xf32>
    %c0_12 = arith.constant 0 : index
    %c0_13 = arith.constant 0 : index
    %c0_14 = arith.constant 0 : index
    %23 = vector.load %arg5[%c0_12, %c0_13, %c0_14] : memref<1x2x1024xf32, #tpu.memory_space<vmem>>, vector<1x2x1024xf32>
    %24 = vector.shape_cast %23 : vector<1x2x1024xf32> to vector<2x1024xf32>
    %25 = vector.shape_cast %22 : vector<2x1024xf32> to vector<1x2x1024xf32>
    tpu.vector_store %arg5[%c0_12, %c0_13, %c0_14], %25 {strides = array<i32>} : memref<1x2x1024xf32, #tpu.memory_space<vmem>>, vector<1x2x1024xf32>,
    return
  }
  func.func @transform_0(%arg0: i32, %arg1: i32) -> (i32, i32) {
    %c1_i32 = arith.constant 1 : i32
    %0 = arith.muli %arg0, %c1_i32 : i32
    %1 = arith.addi %0, %arg1 : i32
    %c0_i32 = arith.constant 0 : i32
    %2 = arith.minsi %1, %c0_i32 : i32
    %c0_i32_0 = arith.constant 0 : i32
    %c0_i32_1 = arith.constant 0 : i32
    return %c0_i32_0, %2 : i32, i32
  }
  func.func @transform_1(%arg0: i32, %arg1: i32) -> (i32, i32) {
    %c1_i32 = arith.constant 1 : i32
    %0 = arith.muli %arg0, %c1_i32 : i32
    %1 = arith.addi %0, %arg1 : i32
    %c0_i32 = arith.constant 0 : i32
    %2 = arith.minsi %1, %c0_i32 : i32
    %c0_i32_0 = arith.constant 0 : i32
    %c0_i32_1 = arith.constant 0 : i32
    return %c0_i32_0, %2 : i32, i32
  }
  func.func @transform_2(%arg0: i32, %arg1: i32) -> (i32, i32, i32) {
    %c0_i32 = arith.constant 0 : i32
    %c0_i32_0 = arith.constant 0 : i32
    %c0_i32_1 = arith.constant 0 : i32
    return %arg0, %c0_i32, %c0_i32_0 : i32, i32, i32
  }
  func.func @transform_3(%arg0: i32, %arg1: i32) -> (i32, i32, i32) {
    %c0_i32 = arith.constant 0 : i32
    %c0_i32_0 = arith.constant 0 : i32
    %c0_i32_1 = arith.constant 0 : i32
    return %arg0, %c0_i32, %c0_i32_0 : i32, i32, i32
  }
}

</mosaic_0001>

<bundles_post_ra>
// kernel: _soft_dice_loss_impl.1
= control target key start
LH: loop header
LB: loop body
LE: loop exit
PB: predicated region body
PF: predicated region fallthrough
CT: control target
= control target key end

     0   :  { %9 = vsyncpa [#allocation3], 0  ;;  %s298_s0 = inlined_call_operand.hbm [shape: f32[2,1024], index: 0, kind: input, shape index: {}]   ;;  %s299_s1 = inlined_call_operand.hbm [shape: f32[2,1024], index: 1, kind: input, shape index: {}]   ;;  %s300_s2 = inlined_call_operand.hbm [shape: f32[1,2,1024], index: 2, kind: output, shape index: {0}]   ;;  %s301_s3 = inlined_call_operand.hbm [shape: f32[1,2,1024], index: 3, kind: output, shape index: {1}]  }
   0x1   :  { %10 = vsyncpa [#allocation6], 0 }
   0x2   :  { %11 = vsyncpa [#allocation4], 0 }
   0x3   :  { %12 = vsyncpa [#allocation9], 0  ;;  %s226_s12 = smov [#allocation2]   ;;  %s227_s14 = smov [#allocation5]  }
   0x4   :  { %s25_s13 = sshll.u32 %s226_s12, 4  ;;  %s41_s15 = sshll.u32 %s227_s14, 4  ;;  %s26_s13 = int_to_ptr.vmem [resolvable:$true] %s25_s13  ;;  %s42_s15 = int_to_ptr.vmem [resolvable:$true] %s41_s15 }
   0x5   :  { %s130_s18 = scalar_lea.hbm %s298_s0, 256 }
   0x6   :  { %p131_p0 = scmp.ne.s32.totalorder %s298_s0, %s130_s18  ;;  %p134_p1 = scmp.lt.u32.totalorder %s130_s18, %s298_s0 }
   0x8   :  { %p136_p2 = pnand %p134_p1, %p131_p0 }
   0xa   :  { %139 = shalt.err (!%p136_p2)
}
   0xb   :  { %s140_s23 = scalar_lea.vmem %s26_s13, 256  ;;  %p145_p4 = scmp.lt.s32.totalorder %s26_s13, %s26_s13 }
   0xc   :  { %p141_p3 = scmp.ne.s32.totalorder %s26_s13, %s140_s23  ;;  %p146_p5 = scmp.lt.s32.totalorder %s140_s23, %s140_s23 }
   0xe   :  { %p147_p6 = por %p146_p5, %p145_p4 }
  0x10   :  { %p148_p7 = pnand %p147_p6, %p141_p3 }
  0x12   :  { %151 = shalt.err (!%p148_p7)
}
  0x13   :  { %28 = dma.hbm_to_vmem [thread:$0]  %s298_s0, 256, %s26_s13, [#allocation3]  }
  0x14   :  { %s152_s28 = scalar_lea.hbm %s299_s1, 256 }
  0x15   :  { %p153_p8 = scmp.ne.s32.totalorder %s299_s1, %s152_s28  ;;  %p156_p9 = scmp.lt.u32.totalorder %s152_s28, %s299_s1 }
  0x17   :  { %p158_p10 = pnand %p156_p9, %p153_p8 }
  0x19   :  { %161 = shalt.err (!%p158_p10)
}
  0x1a   :  { %s162_s6 = scalar_lea.vmem %s42_s15, 256  ;;  %p167_p12 = scmp.lt.s32.totalorder %s42_s15, %s42_s15 }
  0x1b   :  { %p163_p11 = scmp.ne.s32.totalorder %s42_s15, %s162_s6  ;;  %p168_p13 = scmp.lt.s32.totalorder %s162_s6, %s162_s6 }
  0x1d   :  { %p169_p0 = por %p168_p13, %p167_p12 }
  0x1f   :  { %p170_p1 = pnand %p169_p0, %p163_p11 }
  0x21   :  { %173 = shalt.err (!%p170_p1)
}
  0x22   :  { %44 = dma.hbm_to_vmem [thread:$0]  %s299_s1, 256, %s42_s15, [#allocation6]  }
  0x23   :  { %218 = dma.done.wait [#allocation3], 256  }
  0x24   :  { %219 = vsyncadd [#allocation3], 4294967040 }
  0x25   :  { %220 = dma.done.wait [#allocation6], 256  }
  0x26   :  { %221 = vsyncadd [#allocation6], 4294967040  ;;  %v67_v0 = vld [vmem:[#allocation2] sm:$0xff]  ;;  %v69_v1 = vld [vmem:[#allocation5] sm:$0xff]  ;;  %s228_s8 = smov [#allocation7]   ;;  %s229_s10 = smov [#allocation8]  }
  0x27   :  { %v68_v2 = vld [vmem:[#allocation2 + $0x8] sm:$0xff]  ;;  %v71_v3 = vmul.f32 %v69_v1, %v67_v0  ;;  %v70_v4 = vld [vmem:[#allocation5 + $0x8] sm:$0xff]  ;;  %v75_v5 = vadd.f32 %v69_v1, %v67_v0  ;;  %s97_s9 = sshll.u32 %s228_s8, 4  ;;  %s107_s11 = sshll.u32 %s229_s10, 4  ;;  %s98_s9 = int_to_ptr.vmem [resolvable:$true] %s97_s9  ;;  %s108_s11 = int_to_ptr.vmem [resolvable:$true] %s107_s11 }
  0x28   :  { %v72_v6 = vmul.f32 %v70_v4, %v68_v2  ;;  %v76_v7 = vadd.f32 %v70_v4, %v68_v2  ;;  %s174_s1 = scalar_lea.vmem %s98_s9, 256  ;;  %p179_p3 = scmp.lt.s32.totalorder %s98_s9, %s98_s9 }
  0x29   :  { %83 = vst [vmem:[#allocation7] sm:$0xff] %v71_v3  ;;  %89 = vst [vmem:[#allocation8] sm:$0xff] %v75_v5  ;;  %p175_p2 = scmp.ne.s32.totalorder %s98_s9, %s174_s1  ;;  %p180_p4 = scmp.lt.s32.totalorder %s174_s1, %s174_s1 }
  0x2a   :  { %84 = vst [vmem:[#allocation7 + $0x8] sm:$0xff] %v72_v6  ;;  %90 = vst [vmem:[#allocation8 + $0x8] sm:$0xff] %v76_v7 }
  0x2b   :  { %p181_p5 = por %p180_p4, %p179_p3 }
  0x2d   :  { %p182_p6 = pnand %p181_p5, %p175_p2 }
  0x2f   :  { %185 = shalt.err (!%p182_p6)
}
  0x30   :  { %s186_s14 = scalar_lea.hbm %s300_s2, 256 }
  0x31   :  { %p187_p7 = scmp.ne.s32.totalorder %s300_s2, %s186_s14  ;;  %p190_p8 = scmp.lt.u32.totalorder %s186_s14, %s300_s2 }
  0x33   :  { %p192_p9 = pnand %p190_p8, %p187_p7 }
  0x35   :  { %195 = shalt.err (!%p192_p9)
}
  0x36   :  { %100 = dma.vmem_to_hbm [thread:$0]  %s98_s9, 256, %s300_s2, [#allocation4]  }
  0x37   :  { %s196_s21 = scalar_lea.vmem %s108_s11, 256  ;;  %p201_p11 = scmp.lt.s32.totalorder %s108_s11, %s108_s11 }
  0x38   :  { %p197_p10 = scmp.ne.s32.totalorder %s108_s11, %s196_s21  ;;  %p202_p12 = scmp.lt.s32.totalorder %s196_s21, %s196_s21 }
  0x3a   :  { %p203_p13 = por %p202_p12, %p201_p11 }
  0x3c   :  { %p204_p0 = pnand %p203_p13, %p197_p10 }
  0x3e   :  { %207 = shalt.err (!%p204_p0)
}
  0x3f   :  { %s208_s24 = scalar_lea.hbm %s301_s3, 256 }
  0x40   :  { %p209_p1 = scmp.ne.s32.totalorder %s301_s3, %s208_s24  ;;  %p212_p2 = scmp.lt.u32.totalorder %s208_s24, %s301_s3 }
  0x42   :  { %p214_p3 = pnand %p212_p2, %p209_p1 }
  0x44   :  { %217 = shalt.err (!%p214_p3)
}
  0x45   :  { %110 = dma.vmem_to_hbm [thread:$0]  %s108_s11, 256, %s301_s3, [#allocation9]  }
  0x46   :  { %222 = dma.done.wait [#allocation4], 256  }
  0x47   :  { %223 = vsyncadd [#allocation4], 4294967040 }
  0x48   :  { %224 = dma.done.wait [#allocation9], 256  }
  0x49   :  { %225 = vsyncadd [#allocation9], 4294967040 }
  0x4a   :  { %117 = vsyncpa [#allocation3], 1 }
  0x4b   :  { %118 = vsyncpa [#allocation6], 1 }
  0x4c   :  { %119 = vsyncpa [#allocation4], 1 }
  0x4d   :  { %120 = vsyncpa [#allocation9], 1 }

</bundles_post_ra>
